<compile_context>
chip_gen: v7x
topology: tpu7x:2x2x1
jax: 0.10.0
libtpu: 0.0.40
codegen_flags: <defaults>
</compile_context>

<pallas_src>
import functools

import jax
import jax.numpy as jnp
from jax.experimental import pallas as pl
from jax.experimental.pallas import tpu as pltpu


def _round_up(n, m):
    return (n + m - 1) // m * m


@functools.lru_cache(maxsize=1)
def _vmem_limit_bytes():
    """~75% of physical VMEM, capped at 100 MiB (v7x: 48 MiB, v5e/v6e: ~96 MiB)."""
    cap = 0
    try:
        cap = int(getattr(pltpu.get_tpu_info(), "vmem_capacity_bytes", 0) or 0)
    except Exception:
        cap = 0
    if cap <= 0:
        cap = 64 * 1024 * 1024  # conservative fallback (safe on every generation)
    return int(min(cap * 3 // 4, 100 * 1024 * 1024))


def _pick_row_tile(rows, feat, itemsize, budget_bytes, target=1024):
    """Largest sublane(16)-aligned row tile that fits the VMEM budget.

    in + out blocks, each double-buffered => ~4 live (tile_rows, feat) blocks.
    """
    cap = max(16, budget_bytes // (4 * feat * itemsize))
    tr = min(target, cap)
    if rows < tr:
        tr = rows
    return max(16, _round_up(tr, 16))


def _pick_feat_tile(feat, target):
    """Lane-aligned tile that divides feat; falls back to the full extent."""
    for cand in (target, 256, 128):
        if cand <= feat and feat % cand == 0:
            return cand
    return feat  # full-extent block always satisfies the layout constraint


def _fit_matmul_tiles(rows, k_dim, n_dim, vmem_budget, tm, tn):
    """Shrink tm until the fused-kernel working set fits ~60% of the budget."""
    tn = _pick_feat_tile(n_dim, tn)
    tm = max(16, _round_up(min(tm, _round_up(rows, 16)), 16))

    def usage(tm_):
        return (2 * tm_ * k_dim * 4      # x block for LN (f32, double-buffered)
                + tm_ * k_dim * 2        # normed scratch (bf16)
                + 2 * tm_ * tn * 4       # residual block (f32)
                + 2 * k_dim * tn * 2     # weight block (bf16)
                + 2 * tm_ * tn * 4)      # output block (f32)

    while tm > 128 and usage(tm) > (vmem_budget * 3) // 5:
        tm = max(16, _round_up(tm // 2, 16))
    return tm, tn


# ---------------------------------------------------------------------------
# Kernel 1: standalone LayerNorm (generic path). One-pass stats, exact divide.
# ---------------------------------------------------------------------------
def _layernorm_kernel(x_ref, a_ref, b_ref, o_ref, *, eps, feat):
    x = x_ref[...].astype(jnp.float32)                       # (tile_rows, feat)
    s1 = jnp.sum(x, axis=-1, keepdims=True)
    s2 = jnp.sum(x * x, axis=-1, keepdims=True)
    mean = s1 * (1.0 / feat)
    # torch.std default: unbiased (divide by N-1); eps added to std.
    var = jnp.maximum((s2 - s1 * mean) * (1.0 / (feat - 1)), 0.0)
    inv = 1.0 / (jnp.sqrt(var) + eps)
    a = a_ref[...].astype(jnp.float32)
    b = b_ref[...].astype(jnp.float32)
    o_ref[...] = ((x - mean) * inv * a + b).astype(o_ref.dtype)


def layernorm_pallas(x2d, a_2, b_2, *, eps=1e-6, tile_rows=None):
    rows, feat = x2d.shape
    assert feat >= 2, "LayerNorm with unbiased std needs feat >= 2"
    vlim = _vmem_limit_bytes()
    if tile_rows is None:
        tile_rows = _pick_row_tile(rows, feat, x2d.dtype.itemsize, vlim // 2)
    a = a_2.reshape(1, feat).astype(x2d.dtype)
    b = b_2.reshape(1, feat).astype(x2d.dtype)
    kernel = functools.partial(_layernorm_kernel, eps=eps, feat=feat)
    return pl.pallas_call(
        kernel,
        out_shape=jax.ShapeDtypeStruct((rows, feat), x2d.dtype),
        grid_spec=pltpu.PrefetchScalarGridSpec(
            num_scalar_prefetch=0,
            grid=(pl.cdiv(rows, tile_rows),),
            in_specs=[
                pl.BlockSpec((tile_rows, feat), lambda i: (i, 0)),
                pl.BlockSpec((1, feat), lambda i: (0, 0)),   # a_2 stays resident
                pl.BlockSpec((1, feat), lambda i: (0, 0)),   # b_2 stays resident
            ],
            out_specs=pl.BlockSpec((tile_rows, feat), lambda i: (i, 0)),
        ),
        compiler_params=pltpu.CompilerParams(
            dimension_semantics=("parallel",),
            vmem_limit_bytes=vlim),
    )(x2d, a, b)


# ---------------------------------------------------------------------------
# Kernel 2 (fused fast path):  out = x + LayerNorm(x) @ W
#   grid = (rows/tm, N/tn); the (tm, K) x-block stays resident across j,
#   LayerNorm is computed once per row-tile (j == 0) into a bf16 VMEM scratch
#   and reused for every N tile; the MXU runs in bf16 with an f32 accumulator;
#   the residual add is fused into the epilogue.
# ---------------------------------------------------------------------------
def _ln_linear_residual_kernel(x_ref, a_ref, b_ref, res_ref, w_ref, o_ref,
                               normed_ref, *, eps, feat):
    @pl.when(pl.program_id(1) == 0)
    def _():
        x = x_ref[...].astype(jnp.float32)                   # (tm, K)
        s1 = jnp.sum(x, axis=-1, keepdims=True)
        s2 = jnp.sum(x * x, axis=-1, keepdims=True)
        mean = s1 * (1.0 / feat)
        var = jnp.maximum((s2 - s1 * mean) * (1.0 / (feat - 1)), 0.0)
        inv = 1.0 / (jnp.sqrt(var) + eps)                    # eps added to std
        normed = (x - mean) * inv * a_ref[...] + b_ref[...]
        normed_ref[...] = normed.astype(normed_ref.dtype)    # bf16 for the MXU

    acc = jnp.dot(normed_ref[...], w_ref[...],               # bf16 x bf16 -> f32
                  preferred_element_type=jnp.float32)
    o_ref[...] = (acc + res_ref[...].astype(jnp.float32)).astype(o_ref.dtype)


def sublayer_connection_linear(x, w, a_2, b_2, *, eps=1e-6, tm=512, tn=512,
                               mxu_dtype=jnp.bfloat16):
    """Fast path when the sublayer is a linear map y @ w (size -> size)."""
    batch, seq, size = x.shape
    rows = batch * seq
    k_dim, n_dim = w.shape
    assert k_dim == size and n_dim == size, "sublayer must map size -> size"
    assert size >= 2

    x2d = x.reshape(rows, size)
    vlim = _vmem_limit_bytes()
    tm, tn = _fit_matmul_tiles(rows, k_dim, n_dim, vlim, tm, tn)
    a = a_2.reshape(1, size).astype(jnp.float32)
    b = b_2.reshape(1, size).astype(jnp.float32)
    w_mxu = w.astype(mxu_dtype)       # one-time cast; halves weight HBM traffic

    kernel = functools.partial(_ln_linear_residual_kernel, eps=eps, feat=size)
    out2d = pl.pallas_call(
        kernel,
        out_shape=jax.ShapeDtypeStruct((rows, n_dim), x.dtype),
        grid_spec=pltpu.PrefetchScalarGridSpec(
            num_scalar_prefetch=0,
            # NOTE(v7x): keep rows/tm >= 2 on real workloads so both
            # TensorCores get work along the "parallel" axis.
            grid=(pl.cdiv(rows, tm), pl.cdiv(n_dim, tn)),
            in_specs=[
                pl.BlockSpec((tm, k_dim), lambda i, j: (i, 0)),  # x for LN (resident over j)
                pl.BlockSpec((1, k_dim), lambda i, j: (0, 0)),   # a_2
                pl.BlockSpec((1, k_dim), lambda i, j: (0, 0)),   # b_2
                pl.BlockSpec((tm, tn), lambda i, j: (i, j)),     # residual tile of x
                pl.BlockSpec((k_dim, tn), lambda i, j: (0, j)),  # weight (bf16)
            ],
            out_specs=pl.BlockSpec((tm, tn), lambda i, j: (i, j)),
            scratch_shapes=[pltpu.VMEM((tm, k_dim), mxu_dtype)],  # cached normed LHS
        ),
        compiler_params=pltpu.CompilerParams(
            dimension_semantics=("parallel", "arbitrary"),
            vmem_limit_bytes=vlim),
    )(x2d, a, b, x2d, w_mxu)
    return out2d.reshape(batch, seq, n_dim)


# ---------------------------------------------------------------------------
# Generic SublayerConnection: x + dropout(sublayer(norm(x)))
# ---------------------------------------------------------------------------
def sublayer_connection(x, sublayer, a_2, b_2, *, eps=1e-6):
    """x: [batch, seq, size]; `sublayer` is ANY callable on [batch, seq, size]."""
    batch, seq, size = x.shape
    x2d = x.reshape(batch * seq, size)
    normed = layernorm_pallas(x2d, a_2, b_2, eps=eps).reshape(batch, seq, size)
    s = sublayer(normed)
    # dropout in eval mode => identity; residual add left to XLA so it fuses
    # into the sublayer's epilogue (no standalone Pallas add kernel).
    return x + s


# ---------------------------------------------------------------------------
# Pure-JAX reference for verification.
# ---------------------------------------------------------------------------
def sublayer_connection_ref(x, sublayer, a_2, b_2, *, eps=1e-6):
    mean = jnp.mean(x, axis=-1, keepdims=True)
    var = jnp.sum((x - mean) ** 2, axis=-1, keepdims=True) / (x.shape[-1] - 1)
    std = jnp.sqrt(var)
    normed = a_2 * (x - mean) / (std + eps) + b_2
    return x + sublayer(normed)


if __name__ == "__main__":
    batch, seq, size = 2, 8, 128
    key = jax.random.PRNGKey(0)
    kx, kw = jax.random.split(key)

    x = jax.random.normal(kx, (batch, seq, size), dtype=jnp.float32)

    # LayerNorm parameters (matching nn.Parameter defaults).
    a_2 = jnp.ones((size,), dtype=jnp.float32)
    b_2 = jnp.zeros((size,), dtype=jnp.float32)

    # Example sublayer: a simple linear map.
    w = jax.random.normal(kw, (size, size), dtype=jnp.float32) * 0.02

    def sublayer_fn(y):
        return jnp.einsum("bsf,fg->bsg", y, w)

    # Fused fast path: single kernel (LN prologue + bf16 matmul + residual).
    out_fused = jax.block_until_ready(sublayer_connection_linear(x, w, a_2, b_2))
    # Generic path: LN Pallas kernel -> arbitrary sublayer -> fused jnp add.
    out_generic = jax.block_until_ready(
        sublayer_connection(x, sublayer_fn, a_2, b_2))

    ref = sublayer_connection_ref(x, sublayer_fn, a_2, b_2)
    assert out_fused.shape == (batch, seq, size)
    assert out_generic.shape == (batch, seq, size)

    # Generic path is f32 end-to-end -> tight tolerance.
    err_g = float(jnp.max(jnp.abs(out_generic - ref)))
    assert jnp.allclose(out_generic, ref, atol=1e-3, rtol=1e-3), ("generic", err_g)
    # Fused path drives the MXU in bf16 (per perf review): expected max error
    # at these shapes/magnitudes is ~1e-3, so 2e-2 gives a wide safety margin.
    err_f = float(jnp.max(jnp.abs(out_fused - ref)))
    assert jnp.allclose(out_fused, ref, atol=2e-2, rtol=2e-2), ("fused", err_f)

    print("KERNEL_OK")
</pallas_src>

<mosaic_0001>
module attributes {stable_mosaic.version = 11 : i64} {
  func.func @_ln_linear_residual_kernel(%arg0: i32, %arg1: i32, %arg2: memref<16x128xf32, #tpu.memory_space<vmem>>, %arg3: memref<1x128xf32, #tpu.memory_space<vmem>>, %arg4: memref<1x128xf32, #tpu.memory_space<vmem>>, %arg5: memref<16x128xf32, #tpu.memory_space<vmem>>, %arg6: memref<128x128xbf16, #tpu.memory_space<vmem>>, %arg7: memref<16x128xf32, #tpu.memory_space<vmem>>, %arg8: memref<16x128xbf16, #tpu.memory_space<vmem>>) attributes {dimension_semantics = [#tpu.dimension_semantics<parallel>, #tpu.dimension_semantics<arbitrary>], iteration_bounds = array<i64: 1, 1>, scalar_prefetch = 0 : i64, scratch_operands = 1 : i64, tpu.core_type = #tpu.core_type<tc>, window_params = [{transform_indices = @transform_0, window_bounds = array<i64: 16, 128>}, {pipeline_mode = #tpu.pipeline_mode<synchronous>, transform_indices = @transform_1, window_bounds = array<i64: 1, 128>}, {pipeline_mode = #tpu.pipeline_mode<synchronous>, transform_indices = @transform_2, window_bounds = array<i64: 1, 128>}, {transform_indices = @transform_3, window_bounds = array<i64: 16, 128>}, {transform_indices = @transform_4, window_bounds = array<i64: 128, 128>}, {transform_indices = @transform_5, window_bounds = array<i64: 16, 128>}]} {
    %c0_i32 = arith.constant 0 : i32
    %0 = arith.cmpi eq, %arg1, %c0_i32 : i32
    %1 = arith.extui %0 : i1 to i32
    %c0_i32_0 = arith.constant 0 : i32
    %2 = arith.cmpi ne, %1, %c0_i32_0 : i32
    scf.if %2 {
      %c0_8 = arith.constant 0 : index
      %c0_9 = arith.constant 0 : index
      %9 = vector.load %arg2[%c0_8, %c0_9] : memref<16x128xf32, #tpu.memory_space<vmem>>, vector<16x128xf32>
      %cst_10 = arith.constant dense<0.000000e+00> : vector<16xf32>
      %10 = vector.multi_reduction <add>, %9, %cst_10 [1] : vector<16x128xf32> to vector<16xf32>
      %11 = vector.shape_cast %10 : vector<16xf32> to vector<16x1xf32>
      %12 = arith.mulf %9, %9 : vector<16x128xf32>
      %cst_11 = arith.constant dense<0.000000e+00> : vector<16xf32>
      %13 = vector.multi_reduction <add>, %12, %cst_11 [1] : vector<16x128xf32> to vector<16xf32>
      %14 = vector.shape_cast %13 : vector<16xf32> to vector<16x1xf32>
      %cst_12 = arith.constant 7.812500e-03 : f32
      %15 = vector.broadcast %cst_12 : f32 to vector<16x1xf32>
      %16 = arith.mulf %11, %15 : vector<16x1xf32>
      %17 = arith.mulf %11, %16 : vector<16x1xf32>
      %18 = arith.subf %14, %17 : vector<16x1xf32>
      %cst_13 = arith.constant 0.00787401571 : f32
      %19 = vector.broadcast %cst_13 : f32 to vector<16x1xf32>
      %20 = arith.mulf %18, %19 : vector<16x1xf32>
      %cst_14 = arith.constant 0.000000e+00 : f32
      %21 = vector.broadcast %cst_14 : f32 to vector<16x1xf32>
      %22 = arith.maximumf %20, %21 : vector<16x1xf32>
      %23 = math.sqrt %22 : vector<16x1xf32>
      %cst_15 = arith.constant 9.99999997E-7 : f32
      %24 = vector.broadcast %cst_15 : f32 to vector<16x1xf32>
      %25 = arith.addf %23, %24 : vector<16x1xf32>
      %cst_16 = arith.constant 1.000000e+00 : f32
      %26 = vector.broadcast %cst_16 : f32 to vector<16x1xf32>
      %27 = arith.divf %26, %25 : vector<16x1xf32>
      %28 = vector.broadcast %16 : vector<16x1xf32> to vector<16x128xf32>
      %29 = arith.subf %9, %28 : vector<16x128xf32>
      %30 = vector.broadcast %27 : vector<16x1xf32> to vector<16x128xf32>
      %31 = arith.mulf %29, %30 : vector<16x128xf32>
      %c0_17 = arith.constant 0 : index
      %c0_18 = arith.constant 0 : index
      %32 = vector.load %arg3[%c0_17, %c0_18] : memref<1x128xf32, #tpu.memory_space<vmem>>, vector<1x128xf32>
      %33 = vector.broadcast %32 : vector<1x128xf32> to vector<16x128xf32>
      %34 = arith.mulf %31, %33 : vector<16x128xf32>
      %c0_19 = arith.constant 0 : index
      %c0_20 = arith.constant 0 : index
      %35 = vector.load %arg4[%c0_19, %c0_20] : memref<1x128xf32, #tpu.memory_space<vmem>>, vector<1x128xf32>
      %36 = vector.broadcast %35 : vector<1x128xf32> to vector<16x128xf32>
      %37 = arith.addf %34, %36 : vector<16x128xf32>
      %38 = arith.truncf %37 : vector<16x128xf32> to vector<16x128xbf16>
      %c0_21 = arith.constant 0 : index
      %c0_22 = arith.constant 0 : index
      %39 = vector.load %arg8[%c0_21, %c0_22] : memref<16x128xbf16, #tpu.memory_space<vmem>>, vector<16x128xbf16>
      tpu.vector_store %arg8[%c0_21, %c0_22], %38 {strides = array<i32>} : memref<16x128xbf16, #tpu.memory_space<vmem>>, vector<16x128xbf16>,
    } else {
    }
    %c0 = arith.constant 0 : index
    %c0_1 = arith.constant 0 : index
    %3 = vector.load %arg8[%c0, %c0_1] : memref<16x128xbf16, #tpu.memory_space<vmem>>, vector<16x128xbf16>
    %c0_2 = arith.constant 0 : index
    %c0_3 = arith.constant 0 : index
    %4 = vector.load %arg6[%c0_2, %c0_3] : memref<128x128xbf16, #tpu.memory_space<vmem>>, vector<128x128xbf16>
    %cst = arith.constant dense<0.000000e+00> : vector<16x128xf32>
    %5 = tpu.matmul %3, %4, %cst {dimension_numbers = #tpu.dot_dimension_numbers<[1], [0], [0], [1], [0, 0, 1, 1], [], []>} : vector<16x128xbf16>, vector<128x128xbf16>, vector<16x128xf32> -> vector<16x128xf32>
    %c0_4 = arith.constant 0 : index
    %c0_5 = arith.constant 0 : index
    %6 = vector.load %arg5[%c0_4, %c0_5] : memref<16x128xf32, #tpu.memory_space<vmem>>, vector<16x128xf32>
    %7 = arith.addf %5, %6 : vector<16x128xf32>
    %c0_6 = arith.constant 0 : index
    %c0_7 = arith.constant 0 : index
    %8 = vector.load %arg7[%c0_6, %c0_7] : memref<16x128xf32, #tpu.memory_space<vmem>>, vector<16x128xf32>
    tpu.vector_store %arg7[%c0_6, %c0_7], %7 {strides = array<i32>} : memref<16x128xf32, #tpu.memory_space<vmem>>, vector<16x128xf32>,
    return
  }
  func.func @transform_0(%arg0: i32, %arg1: i32) -> (i32, i32) {
    %c0_i32 = arith.constant 0 : i32
    %c0_i32_0 = arith.constant 0 : i32
    return %arg0, %c0_i32 : i32, i32
  }
  func.func @transform_1(%arg0: i32, %arg1: i32) -> (i32, i32) {
    %c0_i32 = arith.constant 0 : i32
    %c0_i32_0 = arith.constant 0 : i32
    %c0_i32_1 = arith.constant 0 : i32
    return %c0_i32, %c0_i32_0 : i32, i32
  }
  func.func @transform_2(%arg0: i32, %arg1: i32) -> (i32, i32) {
    %c0_i32 = arith.constant 0 : i32
    %c0_i32_0 = arith.constant 0 : i32
    %c0_i32_1 = arith.constant 0 : i32
    return %c0_i32, %c0_i32_0 : i32, i32
  }
  func.func @transform_3(%arg0: i32, %arg1: i32) -> (i32, i32) {
    %c0_i32 = arith.constant 0 : i32
    return %arg0, %arg1 : i32, i32
  }
  func.func @transform_4(%arg0: i32, %arg1: i32) -> (i32, i32) {
    %c0_i32 = arith.constant 0 : i32
    %c0_i32_0 = arith.constant 0 : i32
    return %c0_i32, %arg1 : i32, i32
  }
  func.func @transform_5(%arg0: i32, %arg1: i32) -> (i32, i32) {
    %c0_i32 = arith.constant 0 : i32
    return %arg0, %arg1 : i32, i32
  }
}

</mosaic_0001>

<bundles_post_ra>
// kernel: tpu_custom_call.1
= control target key start
LH: loop header
LB: loop body
LE: loop exit
PB: predicated region body
PF: predicated region fallthrough
CT: control target
= control target key end

     0   :  { %10 = vsyncpa [#allocation4], 0  ;;  %s542_s0 = inlined_call_operand.hbm [shape: f32[16,128], index: 0, kind: input, shape index: {}]   ;;  %s543_s1 = inlined_call_operand.vmem [shape: f32[1,128], index: 1, kind: input, shape index: {}]   ;;  %s544_s2 = inlined_call_operand.vmem [shape: f32[1,128], index: 2, kind: input, shape index: {}]   ;;  %s545_s3 = inlined_call_operand.hbm [shape: f32[16,128], index: 3, kind: input, shape index: {}]   ;;  %s546_s4 = inlined_call_operand.hbm [shape: bf16[128,128], index: 4, kind: input, shape index: {}]   ;;  %s547_s5 = inlined_call_operand.hbm [shape: f32[16,128], index: 5, kind: output, shape index: {}]  }
   0x1   :  { %11 = vsyncpa [#allocation7], 0 }
   0x2   :  { %12 = vsyncpa [#allocation5], 0  ;;  %s420_s18 = smov [#allocation6]   ;;  %s421_s20 = smov [#allocation3]  }
   0x3   :  { %s34_s19 = sshll.u32 %s420_s18, 4  ;;  %s18_s21 = sshll.u32 %s421_s20, 4  ;;  %s35_s19 = int_to_ptr.vmem [resolvable:$true] %s34_s19  ;;  %s460_s21 = int_to_ptr.vmem [resolvable:$true] %s18_s21 }
   0x4   :  { %s326_s24 = scalar_lea.hbm %s545_s3, 256 }
   0x5   :  { %p327_p0 = scmp.ne.s32.totalorder %s545_s3, %s326_s24  ;;  %p330_p1 = scmp.lt.u32.totalorder %s326_s24, %s545_s3 }
   0x7   :  { %p332_p2 = pnand %p330_p1, %p327_p0 }
   0x9   :  { %335 = shalt.err (!%p332_p2)
}
   0xa   :  { %s336_s29 = scalar_lea.vmem %s35_s19, 256  ;;  %p341_p4 = scmp.lt.s32.totalorder %s35_s19, %s35_s19 }
   0xb   :  { %p337_p3 = scmp.ne.s32.totalorder %s35_s19, %s336_s29  ;;  %p342_p5 = scmp.lt.s32.totalorder %s336_s29, %s336_s29 }
   0xd   :  { %p343_p6 = por %p342_p5, %p341_p4 }
   0xf   :  { %p344_p7 = pnand %p343_p6, %p337_p3 }
  0x11   :  { %347 = shalt.err (!%p344_p7)
}
  0x12   :  { %s422_s30 = smov 128   ;;  %s423_s6 = smov 8  }
  0x13   :  { %40 = dma.hbm_to_vmem [thread:$0]  %s545_s3, 256, %s35_s19, [#allocation7], %s422_s30, %s422_s30, %s423_s6  }
  0x14   :  { %s348_s11 = scalar_lea.hbm %s542_s0, 256 }
  0x15   :  { %p349_p8 = scmp.ne.s32.totalorder %s542_s0, %s348_s11  ;;  %p352_p9 = scmp.lt.u32.totalorder %s348_s11, %s542_s0 }
  0x17   :  { %p354_p10 = pnand %p352_p9, %p349_p8 }
  0x19   :  { %357 = shalt.err (!%p354_p10)
}
  0x1a   :  { %s358_s16 = scalar_lea.vmem %s460_s21, 256  ;;  %p363_p12 = scmp.lt.s32.totalorder %s460_s21, %s460_s21 }
  0x1b   :  { %p359_p11 = scmp.ne.s32.totalorder %s460_s21, %s358_s16  ;;  %p364_p13 = scmp.lt.s32.totalorder %s358_s16, %s358_s16 }
  0x1d   :  { %p365_p0 = por %p364_p13, %p363_p12 }
  0x1f   :  { %p366_p1 = pnand %p365_p0, %p359_p11 }
  0x21   :  { %369 = shalt.err (!%p366_p1)
}
  0x22   :  { %24 = dma.hbm_to_vmem [thread:$0]  %s542_s0, 256, %s460_s21, [#allocation4], %s422_s30, %s422_s30, %s423_s6  }
  0x23   :  { %s424_s18 = smov [#allocation8]   ;;  %s370_s23 = scalar_lea.hbm %s546_s4, 1024 }
  0x24   :  { %s46_s19 = sshll.u32 %s424_s18, 4  ;;  %p371_p2 = scmp.ne.s32.totalorder %s546_s4, %s370_s23  ;;  %s47_s19 = int_to_ptr.vmem [resolvable:$true] %s46_s19 }
  0x25   :  { %p374_p3 = scmp.lt.u32.totalorder %s370_s23, %s546_s4 }
  0x27   :  { %p376_p4 = pnand %p374_p3, %p371_p2 }
  0x29   :  { %379 = shalt.err (!%p376_p4)
}
  0x2a   :  { %s380_s28 = scalar_lea.vmem %s47_s19, 1024  ;;  %p385_p6 = scmp.lt.s32.totalorder %s47_s19, %s47_s19 }
  0x2b   :  { %p381_p5 = scmp.ne.s32.totalorder %s47_s19, %s380_s28  ;;  %p386_p7 = scmp.lt.s32.totalorder %s380_s28, %s380_s28 }
  0x2d   :  { %p387_p8 = por %p386_p7, %p385_p6 }
  0x2f   :  { %p388_p9 = pnand %p387_p8, %p381_p5 }
  0x31   :  { %391 = shalt.err (!%p388_p9)
}
  0x32   :  { %s425_s0 = smov 64   ;;  %s426_s21 = smov 4  }
  0x33   :  { %52 = dma.hbm_to_vmem [thread:$0]  %s546_s4, 1024, %s47_s19, [#allocation7], %s425_s0, %s425_s0, %s426_s21  }
  0x34   :  { %414 = dma.done.wait [#allocation4], 256  }
  0x35   :  { %415 = vsyncadd [#allocation4], 4294967040 }
  0x36   :  { %416 = dma.done.wait [#allocation7], 1280  }
  0x37   :  { %417 = vsyncadd [#allocation7], 4294966016  ;;  %v509_v0 = vld [vmem:[#allocation3] sm:$0xff]  ;;  %v511_v1 = vld [vmem:[#allocation3 + $0x8] sm:$0xff]  ;;  %v427_v5 = vmov 0.0   ;;  %vm428_vm0 = vmmov 0  }
  0x38   :  { %69 = vadd.xlane.f32.xlu0 %v509_v0  ;;  %v73_v2 = vmul.f32 %v509_v0, %v509_v0  ;;  %v74_v3 = vmul.f32 %v511_v1, %v511_v1  ;;  %v310_v4 = vld [vmem:[#allocation8] sm:$0xff]   ;;  %280 = vmatprep.subr.bf16.mxu0 %v427_v5  ;;  %v311_v6 = vld [vmem:[#allocation8 + $0x8] sm:$0xff]   ;;  %v312_v7 = vld [vmem:[#allocation8 + $0x10] sm:$0xff]   ;;  %s429_s11 = smov [#allocation9]  }
  0x39   :  { %281 = vmatpush3.bf16.msra.mxu0 %v310_v4  ;;  %v313_v8 = vld [vmem:[#allocation8 + $0x18] sm:$0xff]   ;;  %296 = vmatprep.mubr.msk.bf16.mxu0 %vm428_vm0, %v427_v5  ;;  %v314_v9 = vld [vmem:[#allocation8 + $0x20] sm:$0xff]   ;;  %v315_v10 = vld [vmem:[#allocation8 + $0x28] sm:$0xff]   ;;  %s248_s12 = sshll.u32 %s429_s11, 4  ;;  %s249_s12 = int_to_ptr.vmem [resolvable:$true] %s248_s12 }
  0x3a   :  { %75 = vadd.xlane.f32.xlu1 %v73_v2  ;;  %282 = vmatprep.subr.bf16.mxu0 %v427_v5  ;;  %v316_v11 = vld [vmem:[#allocation8 + $0x30] sm:$0xff]   ;;  %v317_v12 = vld [vmem:[#allocation8 + $0x38] sm:$0xff]   ;;  %v261_v42 = vld [vmem:[%s543_s1] ss:$0 sm:$0xff]  ;;  %s392_s1 = scalar_lea.vmem %s249_s12, 256  ;;  %p397_p11 = scmp.lt.s32.totalorder %s249_s12, %s249_s12 }
  0x3b   :  { %v262_v47 = vld [vmem:[%s544_s2] ss:$0 sm:$0xff]  ;;  %v150_v52 = vld [vmem:[#allocation6] sm:$0xff]  ;;  %v151_v54 = vld [vmem:[#allocation6 + $0x8] sm:$0xff]  ;;  %p393_p10 = scmp.ne.s32.totalorder %s249_s12, %s392_s1  ;;  %p398_p12 = scmp.lt.s32.totalorder %s392_s1, %s392_s1 }
  0x3c   :  { %71 = vadd.xlane.f32.xlu0 %v511_v1 }
  0x3d   :  { %283 = vmatpush3.bf16.msra.mxu0 %v311_v6  ;;  %p399_p13 = por %p398_p12, %p397_p11 }
  0x3e   :  { %77 = vadd.xlane.f32.xlu1 %v74_v3  ;;  %284 = vmatprep.subr.bf16.mxu0 %v427_v5 }
  0x3f   :  { %p400_p0 = pnand %p399_p13, %p393_p10 }
  0x41   :  { %285 = vmatpush3.bf16.msra.mxu0 %v312_v7 }
  0x42   :  { %286 = vmatprep.subr.bf16.mxu0 %v427_v5 }
  0x45   :  { %287 = vmatpush3.bf16.msra.mxu0 %v313_v8 }
  0x46   :  { %288 = vmatprep.subr.bf16.mxu0 %v427_v5 }
  0x49   :  { %289 = vmatpush3.bf16.msra.mxu0 %v314_v9 }
  0x4a   :  { %290 = vmatprep.subr.bf16.mxu0 %v427_v5 }
  0x4d   :  { %291 = vmatpush3.bf16.msra.mxu0 %v315_v10 }
  0x4e   :  { %292 = vmatprep.subr.bf16.mxu0 %v427_v5 }
  0x51   :  { %293 = vmatpush3.bf16.msra.mxu0 %v316_v11 }
  0x52   :  { %294 = vmatprep.subr.bf16.mxu0 %v427_v5 }
  0x55   :  { %295 = vmatpush3.bf16.msra.mxu0 %v317_v12 }
  0xc5   :  { %v70_v13 = vpop.xlane.xlu0 %69 }
  0xc6   :  { %v79_v14 = vmul.f32 0.0078125, %v70_v13 }
  0xc7   :  { %v76_v15 = vpop.xlane.xlu1 %75 }
  0xc8   :  { %v81_v16 = vmul.f32 %v79_v14, %v70_v13  ;;  %v109_v40 = vsub.f32 %v509_v0, %v79_v14 }
  0xc9   :  { %v72_v17 = vpop.xlane.xlu0 %71 }
  0xca   :  { %v80_v18 = vmul.f32 0.0078125, %v72_v17  ;;  %v83_v19 = vsub.f32 %v76_v15, %v81_v16 }
  0xcb   :  { %v78_v20 = vpop.xlane.xlu1 %77 }
  0xcc   :  { %v82_v21 = vmul.f32 %v80_v18, %v72_v17  ;;  %v85_v22 = vmul.f32 0.007874016, %v83_v19  ;;  %v110_v43 = vsub.f32 %v511_v1, %v80_v18 }
  0xce   :  { %v87_v23 = vmax.f32 %v85_v22, 0.0  ;;  %v84_v24 = vsub.f32 %v78_v20, %v82_v21 }
  0xd0   :  { %318 = vrsqrt.f32 %v87_v23  ;;  %v86_v25 = vmul.f32 0.007874016, %v84_v24  ;;  %vm91_vm1 = vcmp.eq.f32.partialorder %v87_v23, inf  ;;  %v94_v29 = vand.u32 2147483648, %v87_v23 }
  0xd1   :  { %vm93_vm2 = vcmp.eq.f32.partialorder %v87_v23, 0.0 }
  0xd2   :  { %v88_v26 = vmax.f32 %v86_v25, 0.0 }
  0xd4   :  { %320 = vrsqrt.f32 %v88_v26  ;;  %vm98_vm3 = vcmp.eq.f32.partialorder %v88_v26, inf  ;;  %v101_v35 = vand.u32 2147483648, %v88_v26  ;;  %vm100_vm4 = vcmp.eq.f32.partialorder %v88_v26, 0.0 }
  0xda   :  { %v319_v27 = vpop.eup %318 }
  0xdb   :  { %v90_v28 = vmul.f32 %v319_v27, %v87_v23 }
  0xdd   :  { %v92_v30 = vsel %vm91_vm1, %v87_v23, %v90_v28 }
  0xde   :  { %v95_v31 = vsel %vm93_vm2, %v94_v29, %v92_v30  ;;  %v321_v32 = vpop.eup %320 }
  0xdf   :  { %v103_v33 = vadd.f32 1e-06, %v95_v31  ;;  %v97_v34 = vmul.f32 %v321_v32, %v88_v26 }
  0xe1   :  { %322 = vrcp.f32 %v103_v33  ;;  %v99_v36 = vsel %vm98_vm3, %v88_v26, %v97_v34 }
  0xe2   :  { %v102_v37 = vsel %vm100_vm4, %v101_v35, %v99_v36 }
  0xe3   :  { %v104_v38 = vadd.f32 1e-06, %v102_v37 }
  0xe5   :  { %324 = vrcp.f32 %v104_v38 }
  0xeb   :  { %v323_v39 = vpop.eup %322 }
  0xec   :  { %v111_v41 = vmul.f32 %v323_v39, %v109_v40 }
  0xee   :  { %v120_v46 = vmul.f32 %v261_v42, %v111_v41 }
  0xef   :  { %v325_v44 = vpop.eup %324 }
  0xf0   :  { %v112_v45 = vmul.f32 %v325_v44, %v110_v43  ;;  %v129_v49 = vadd.f32 %v262_v47, %v120_v46 }
  0xf2   :  { %v121_v48 = vmul.f32 %v261_v42, %v112_v45 }
  0xf4   :  { %v130_v50 = vadd.f32 %v262_v47, %v121_v48 }
  0xf6   :  { %v131_v51 = vpack.c.bf16 %v130_v50, %v129_v49 }
  0xf8   :  { %297 = vmatmul.mubr.bf16.vlgmr.msra.gmra.mrb[0].mxu0 %v131_v51 }
 0x1cb   :  { %v234_v53 = vpop.f32.mrb[0].mxu0 }
 0x1cc   :  { %v235_v55 = vadd.f32 %v234_v53, %v150_v52  ;;  %v298_v56 = vpop.f32.mrb[1].mxu0 }
 0x1cd   :  { %v237_v57 = vpop.f32.mrb[2].mxu0 }
 0x1ce   :  { %241 = vst [vmem:[#allocation9] sm:$0xff] %v235_v55  ;;  %v238_v58 = vadd.f32 %v237_v57, %v151_v54  ;;  %v299_v59 = vpop.f32.mrb[3].mxu0 }
 0x1d0   :  { %242 = vst [vmem:[#allocation9 + $0x8] sm:$0xff] %v238_v58 }
 0x1d1   :  { %403 = shalt.err (!%p400_p0)
}
 0x1d2   :  { %s404_s14 = scalar_lea.hbm %s547_s5, 256 }
 0x1d3   :  { %p405_p1 = scmp.ne.s32.totalorder %s547_s5, %s404_s14  ;;  %p408_p2 = scmp.lt.u32.totalorder %s404_s14, %s547_s5 }
 0x1d5   :  { %p410_p3 = pnand %p408_p2, %p405_p1 }
 0x1d7   :  { %413 = shalt.err (!%p410_p3)
}
 0x1d8   :  { %254 = dma.vmem_to_hbm [thread:$0]  %s249_s12, 256, %s547_s5, [#allocation5], %s422_s30, %s422_s30, %s423_s6  }
 0x1d9   :  { %418 = dma.done.wait [#allocation5], 256  }
 0x1da   :  { %419 = vsyncadd [#allocation5], 4294967040 }
 0x1db   :  { %258 = vsyncpa [#allocation4], 1 }
 0x1dc   :  { %259 = vsyncpa [#allocation7], 1 }
 0x1dd   :  { %260 = vsyncpa [#allocation5], 1 }

</bundles_post_ra>
